<compile_context>
chip_gen: v7x
topology: tpu7x:2x2x1
jax: 0.10.0
libtpu: 0.0.40
codegen_flags: <defaults>
</compile_context>

<pallas_src>
import functools
import math

import jax
import jax.numpy as jnp
from jax.experimental import pallas as pl
from jax.experimental.pallas import tpu as pltpu


def _round_up(a, b):
    return (a + b - 1) // b * b


# ---------------------------------------------------------------------------
# Kernels
# ---------------------------------------------------------------------------
def _make_soft_kernel(sign_beta, inv_beta, is_erosion):
    """soft_max=True path: factorized logsumexp via one MXU matmul."""

    def kernel(patch_ref, ew_ref, mw_ref, o_ref):
        p = patch_ref[...].astype(jnp.float32)            # (Mp, tl)
        zp = p * sign_beta                                # s * beta * p
        m_p = jnp.max(zp, axis=0, keepdims=True)          # (1, tl)  one XLU reduce
        e_p = jnp.exp(zp - m_p)                           # (Mp, tl) one EUP pass
        e_w = ew_ref[...].astype(jnp.float32)             # (O, Mp)
        s = jnp.dot(e_w, e_p, preferred_element_type=jnp.float32)  # (O, tl) MXU
        out = (m_p + mw_ref[...] + jnp.log(s)) * inv_beta  # (O, tl)
        if is_erosion:
            out = -out
        o_ref[...] = out.astype(o_ref.dtype)

    return kernel


def _make_hard_kernel(out_channels, sign, is_erosion):
    """soft_max=False path: exact max over the reduction dim, small static
    loop over out channels, writing lane-dense rows of the (O, tl) block."""

    def kernel(patch_ref, wt_ref, o_ref):
        p = patch_ref[...].astype(jnp.float32)            # (Mp, tl)
        sp = p * sign
        wt = wt_ref[...].astype(jnp.float32)              # (Mp, O)
        for oc in range(out_channels):
            z = wt[:, oc:oc + 1] + sp                     # (Mp, tl)
            r = jnp.max(z, axis=0, keepdims=True)         # (1, tl)
            if is_erosion:
                r = -r
            o_ref[pl.ds(oc, 1), :] = r.astype(o_ref.dtype)

    return kernel


# ---------------------------------------------------------------------------
# Wrapper glue (padding + unfold, matching nn.Unfold ordering exactly)
# ---------------------------------------------------------------------------
def _unfold_patches(x, kernel_size):
    """fixed_padding + nn.Unfold(kernel_size, stride=1, dilation=1).

    x: (B, C, H, W)  ->  (B, C*K*K, H*W), flat index = c*K*K + kh*K + kw.
    """
    B, C, H, W = x.shape
    K = kernel_size
    pad_total = K - 1  # dilation = 1
    pad_beg = pad_total // 2
    pad_end = pad_total - pad_beg
    xp = jnp.pad(x, ((0, 0), (0, 0), (pad_beg, pad_end), (pad_beg, pad_end)))
    # patches[b, c, kh, kw, h, w] = xp[b, c, h+kh, w+kw]
    patches = jnp.stack(
        [jnp.stack([xp[:, :, i:i + H, j:j + W] for j in range(K)], axis=3)
         for i in range(K)],
        axis=2)                                            # (B, C, K, K, H, W)
    return patches.reshape(B, C * K * K, H * W)            # == torch unfold


@functools.partial(jax.jit, static_argnames=("kernel_size", "beta", "soft_max",
                                             "op_type", "tl", "patch_dtype"))
def morphology_forward(x, weight, *, kernel_size=5, beta=15.0, soft_max=True,
                       op_type="erosion2d", tl=None, patch_dtype=None):
    """Equivalent of Morphology.forward.

    x: (B, C, H, W), weight: (O, C, K, K).
    patch_dtype: optionally store the unfolded patch matrix in a narrower
      dtype (e.g. jnp.bfloat16) to halve the dominant HBM read on v6e/v7x;
      compute stays in f32.
    """
    if op_type not in ("erosion2d", "dilation2d"):
        raise ValueError(op_type)
    B, C, H, W = x.shape
    assert H == W, "module's L_sqrt reshape assumes square spatial dims"
    O = weight.shape[0]
    K = kernel_size
    M = C * K * K
    L = H * W

    Mp = _round_up(M, 128)
    if tl is None:
        tl = min(2048, _round_up(L, 128))   # large lane-dense tile
    Lp = _round_up(L, tl)

    # Patch matrix (B, Mp, Lp): reduction dim on sublanes, pixels on lanes.
    patches = _unfold_patches(x, K)
    if patch_dtype is not None:
        patches = patches.astype(patch_dtype)
    patches = jnp.pad(patches, ((0, 0), (0, Mp - M), (0, Lp - L)))

    # Weight, reduction dim padded with a large negative so padding columns
    # contribute exp -> 0 and never win the hard max.
    NEG = -1e30
    w2 = weight.reshape(O, M).astype(jnp.float32)
    w2p = jnp.pad(w2, ((0, 0), (0, Mp - M)), constant_values=NEG)

    is_erosion = op_type == "erosion2d"
    sign = -1.0 if is_erosion else 1.0
    grid = (B, Lp // tl)
    compiler_params = pltpu.CompilerParams(
        dimension_semantics=("parallel", "parallel"),
        vmem_limit_bytes=32 * 1024 * 1024)   # safe on v5e/v6e/v7x
    out_shape = jax.ShapeDtypeStruct((B, O, Lp), x.dtype)
    patch_spec = pl.BlockSpec((None, Mp, tl), lambda b, i: (b, 0, i))
    out_spec = pl.BlockSpec((None, O, tl), lambda b, i: (b, 0, i))

    if soft_max:
        # Precompute the weight-side factor of the factorized logsumexp.
        zw = w2p * float(beta)
        m_w = jnp.max(zw, axis=1, keepdims=True)          # (O, 1)
        e_w = jnp.exp(zw - m_w)                           # (O, Mp); pad cols -> 0
        kernel = _make_soft_kernel(sign * float(beta), 1.0 / float(beta),
                                   is_erosion)
        out = pl.pallas_call(
            kernel,
            out_shape=out_shape,
            grid_spec=pltpu.PrefetchScalarGridSpec(
                num_scalar_prefetch=0,
                grid=grid,
                in_specs=[
                    patch_spec,
                    pl.BlockSpec((O, Mp), lambda b, i: (0, 0)),
                    pl.BlockSpec((O, 1), lambda b, i: (0, 0)),
                ],
                out_specs=out_spec,
            ),
            compiler_params=compiler_params,
        )(patches, e_w, m_w)
    else:
        wt = w2p.T                                        # (Mp, O)
        kernel = _make_hard_kernel(O, sign, is_erosion)
        out = pl.pallas_call(
            kernel,
            out_shape=out_shape,
            grid_spec=pltpu.PrefetchScalarGridSpec(
                num_scalar_prefetch=0,
                grid=grid,
                in_specs=[
                    patch_spec,
                    pl.BlockSpec((Mp, O), lambda b, i: (0, 0)),
                ],
                out_specs=out_spec,
            ),
            compiler_params=compiler_params,
        )(patches, wt)

    # (B, O, Lp) -> (B, O, H, W)   (already in the PyTorch output layout)
    L_sqrt = int(math.sqrt(L))
    return out[:, :, :L].reshape(B, O, L_sqrt, L_sqrt)


# ---------------------------------------------------------------------------
# Pure-JAX reference mirroring the PyTorch forward (for verification)
# ---------------------------------------------------------------------------
def morphology_reference(x, weight, *, kernel_size=5, beta=15.0, soft_max=True,
                         op_type="erosion2d"):
    B, C, H, W = x.shape
    O = weight.shape[0]
    K = kernel_size
    L = H * W
    xu = _unfold_patches(x, K)[:, None, :, :]              # (B, 1, M, L)
    w2 = weight.reshape(O, -1)[None, :, :, None]           # (1, O, M, 1)
    z = w2 - xu if op_type == "erosion2d" else w2 + xu
    if soft_max:
        r = jax.scipy.special.logsumexp(z * beta, axis=2) / beta
    else:
        r = jnp.max(z, axis=2)
    if op_type == "erosion2d":
        r = -r
    L_sqrt = int(math.sqrt(L))
    return r.reshape(B, O, L_sqrt, L_sqrt)


if __name__ == "__main__":
    # Small deterministic config consistent with the module.
    B, C, H, W = 2, 4, 16, 16
    O, K = 4, 5

    key = jax.random.PRNGKey(0)
    kx, kw = jax.random.split(key)
    x = jax.random.normal(kx, (B, C, H, W), dtype=jnp.float32)
    # nn.Parameter is zero-initialized in __init__; use deterministic small
    # random values instead so the kernel check is non-trivial.
    weight = 0.1 * jax.random.normal(kw, (O, C, K, K), dtype=jnp.float32)

    for op_type in ("erosion2d", "dilation2d"):
        for soft_max in (True, False):
            out = morphology_forward(x, weight, kernel_size=K, beta=15.0,
                                     soft_max=soft_max, op_type=op_type)
            out = jax.block_until_ready(out)
            ref = morphology_reference(x, weight, kernel_size=K, beta=15.0,
                                       soft_max=soft_max, op_type=op_type)
            assert out.shape == (B, O, H, W)
            assert jnp.allclose(out, ref, atol=1e-4, rtol=1e-4), \
                f"mismatch for {op_type}, soft_max={soft_max}"

    # bf16 patch-storage path (halves the dominant HBM read on v6e/v7x);
    # compute stays f32, so only input rounding error remains.
    out_bf16 = morphology_forward(x, weight, kernel_size=K, beta=15.0,
                                  soft_max=True, op_type="erosion2d",
                                  patch_dtype=jnp.bfloat16)
    out_bf16 = jax.block_until_ready(out_bf16)
    ref = morphology_reference(x, weight, kernel_size=K, beta=15.0,
                               soft_max=True, op_type="erosion2d")
    assert jnp.allclose(out_bf16, ref, atol=1e-1, rtol=1e-1), "bf16 path mismatch"

    print("KERNEL_OK")
</pallas_src>

<mosaic_0001>
module attributes {stable_mosaic.version = 11 : i64} {
  func.func @kernel(%arg0: i32, %arg1: i32, %arg2: memref<1x128x256xf32, #tpu.memory_space<vmem>>, %arg3: memref<4x128xf32, #tpu.memory_space<vmem>>, %arg4: memref<4x1xf32, #tpu.memory_space<vmem>>, %arg5: memref<1x4x256xf32, #tpu.memory_space<vmem>>) attributes {dimension_semantics = [#tpu.dimension_semantics<parallel>, #tpu.dimension_semantics<parallel>], iteration_bounds = array<i64: 2, 1>, scalar_prefetch = 0 : i64, scratch_operands = 0 : i64, tpu.core_type = #tpu.core_type<tc>, window_params = [{transform_indices = @transform_0, window_bounds = array<i64: 1, 128, 256>}, {pipeline_mode = #tpu.pipeline_mode<synchronous>, transform_indices = @transform_1, window_bounds = array<i64: 4, 128>}, {pipeline_mode = #tpu.pipeline_mode<synchronous>, transform_indices = @transform_2, window_bounds = array<i64: 4, 1>}, {transform_indices = @transform_3, window_bounds = array<i64: 1, 4, 256>}]} {
    %c0 = arith.constant 0 : index
    %c0_0 = arith.constant 0 : index
    %c0_1 = arith.constant 0 : index
    %0 = vector.load %arg2[%c0, %c0_0, %c0_1] : memref<1x128x256xf32, #tpu.memory_space<vmem>>, vector<1x128x256xf32>
    %1 = vector.shape_cast %0 : vector<1x128x256xf32> to vector<128x256xf32>
    %cst = arith.constant -1.500000e+01 : f32
    %2 = vector.broadcast %cst : f32 to vector<128x256xf32>
    %3 = arith.mulf %1, %2 : vector<128x256xf32>
    %cst_2 = arith.constant dense<0xFF800000> : vector<256xf32>
    %4 = vector.multi_reduction <maximumf>, %3, %cst_2 [0] : vector<128x256xf32> to vector<256xf32>
    %5 = vector.shape_cast %4 : vector<256xf32> to vector<1x256xf32>
    %6 = vector.broadcast %5 : vector<1x256xf32> to vector<128x256xf32>
    %7 = arith.subf %3, %6 : vector<128x256xf32>
    %8 = math.exp %7 : vector<128x256xf32>
    %c0_3 = arith.constant 0 : index
    %c0_4 = arith.constant 0 : index
    %9 = vector.load %arg3[%c0_3, %c0_4] : memref<4x128xf32, #tpu.memory_space<vmem>>, vector<4x128xf32>
    %cst_5 = arith.constant dense<0.000000e+00> : vector<4x256xf32>
    %10 = tpu.matmul %9, %8, %cst_5 {dimension_numbers = #tpu.dot_dimension_numbers<[1], [0], [0], [1], [0, 0, 1, 1], [], []>} : vector<4x128xf32>, vector<128x256xf32>, vector<4x256xf32> -> vector<4x256xf32>
    %c0_6 = arith.constant 0 : index
    %c0_7 = arith.constant 0 : index
    %11 = vector.load %arg4[%c0_6, %c0_7] : memref<4x1xf32, #tpu.memory_space<vmem>>, vector<4x1xf32>
    %12 = vector.broadcast %5 : vector<1x256xf32> to vector<4x256xf32>
    %13 = vector.broadcast %11 : vector<4x1xf32> to vector<4x256xf32>
    %14 = arith.addf %12, %13 : vector<4x256xf32>
    %15 = math.log %10 : vector<4x256xf32>
    %16 = arith.addf %14, %15 : vector<4x256xf32>
    %cst_8 = arith.constant 0.0666666701 : f32
    %17 = vector.broadcast %cst_8 : f32 to vector<4x256xf32>
    %18 = arith.mulf %16, %17 : vector<4x256xf32>
    %cst_9 = arith.constant 0.000000e+00 : f32
    %19 = vector.broadcast %cst_9 : f32 to vector<4x256xf32>
    %20 = arith.subf %19, %18 : vector<4x256xf32>
    %c0_10 = arith.constant 0 : index
    %c0_11 = arith.constant 0 : index
    %c0_12 = arith.constant 0 : index
    %21 = vector.load %arg5[%c0_10, %c0_11, %c0_12] : memref<1x4x256xf32, #tpu.memory_space<vmem>>, vector<1x4x256xf32>
    %22 = vector.shape_cast %21 : vector<1x4x256xf32> to vector<4x256xf32>
    %23 = vector.shape_cast %20 : vector<4x256xf32> to vector<1x4x256xf32>
    tpu.vector_store %arg5[%c0_10, %c0_11, %c0_12], %23 {strides = array<i32>} : memref<1x4x256xf32, #tpu.memory_space<vmem>>, vector<1x4x256xf32>,
    return
  }
  func.func @transform_0(%arg0: i32, %arg1: i32) -> (i32, i32, i32) {
    %c0_i32 = arith.constant 0 : i32
    %c0_i32_0 = arith.constant 0 : i32
    return %arg0, %c0_i32, %arg1 : i32, i32, i32
  }
  func.func @transform_1(%arg0: i32, %arg1: i32) -> (i32, i32) {
    %c0_i32 = arith.constant 0 : i32
    %c0_i32_0 = arith.constant 0 : i32
    %c0_i32_1 = arith.constant 0 : i32
    return %c0_i32, %c0_i32_0 : i32, i32
  }
  func.func @transform_2(%arg0: i32, %arg1: i32) -> (i32, i32) {
    %c0_i32 = arith.constant 0 : i32
    %c0_i32_0 = arith.constant 0 : i32
    %c0_i32_1 = arith.constant 0 : i32
    return %c0_i32, %c0_i32_0 : i32, i32
  }
  func.func @transform_3(%arg0: i32, %arg1: i32) -> (i32, i32, i32) {
    %c0_i32 = arith.constant 0 : i32
    %c0_i32_0 = arith.constant 0 : i32
    return %arg0, %c0_i32, %arg1 : i32, i32, i32
  }
}

</mosaic_0001>

<bundles_post_ra>
// kernel: morphology_forward.1
= control target key start
LH: loop header
LB: loop body
LE: loop exit
PB: predicated region body
PF: predicated region fallthrough
CT: control target
= control target key end

     0   :  { %s780_s12 = smov 0   ;;  %s782_s13 = smov 0   ;;  %s1023_s0 = inlined_call_operand.vmem [shape: f32[2,128,256], index: 0, kind: input, shape index: {}]   ;;  %s1024_s1 = inlined_call_operand.vmem [shape: f32[4,128], index: 1, kind: input, shape index: {}]   ;;  %s1025_s2 = inlined_call_operand.vmem [shape: f32[4,1], index: 2, kind: input, shape index: {}]   ;;  %s1026_s3 = inlined_call_operand.vmem [shape: f32[2,4,256], index: 3, kind: output, shape index: {}]  }
   0x1   :  { %s784_s14 = smov 0  }
   0x2 LB: > { %s25_s15 = sadd.s32 1, %s752_s13  ;;  %p598_p0 = scmp.ge.s32.totalorder %s756_s14, 1  ;;  %s756_s14 = sphi %s784_s14, %s13_s14   ;;  %s752_s13 = sphi %s782_s13, %s1028_s13   ;;  %s748_s12 = sphi %s780_s12, %s1027_s12  }
   0x3   : > { %p27_p1 = scmp.ge.s32.totalorder %s25_s15, 2  ;;  %p158_p2 = scmp.lt.s32.totalorder %s756_s14, 3 }
   0x5   : > { %s1030_s15 = smov (%p27_p1, %s25_s15), 0  ;;  %p159_p3 = pnand %p598_p0, %p158_p2 }
   0x6   : > { %p191_p4 = scmp.lt.s32.totalorder (!%p159_p3), %s748_s12, 1  ;;  %v758_v0 = vmov (!%p159_p3), 0.0   ;;  %v759_v1 = vmov (!%p159_p3), 0   ;;  %v484_v2 = vld [vmem:[%s1025_s2] sm:$0xf] (!%p159_p3) }
   0x7   : > { %162 = sbr.rel (%p159_p3) target bundleno = 340 (0x154), region = 32  ;;  %477 = vmatprep.mubr.f32.mxu0 (!%p159_p3), %v758_v0  ;;  %665 = vset.pattern.permute.xlu0 (!%p159_p3), %v759_v1 }
   0x8   : > { %487 = vperm.xlu0 (!%p159_p3), %665, %v484_v2  }
   0xe   : > { %s1032_s12 = smov (!%p191_p4, %s748_s12), 1 }
   0xf   : > { %s605_s18 = sshll.u32 %s1032_s12, 8  ;;  %s606_s24 = sshll.u32 %s1032_s12, 3 }
  0x10   : > { %s807_s21 = scalar_lea.vmem %s1023_s0, %s605_s18  ;;  %s208_s27 = scalar_lea.vmem %s1026_s3, %s606_s24 }
  0x11   : > { %v211_v3 = vld [vmem:[%s807_s21 + $0x8] sm:$0xff]  ;;  %v213_v4 = vld [vmem:[%s807_s21 + $0x18] sm:$0xff]  ;;  %v210_v28 = vld [vmem:[%s807_s21] sm:$0xff] }
  0x12   : > { %v215_v5 = vld [vmem:[%s807_s21 + $0x28] sm:$0xff]  ;;  %v217_v6 = vld [vmem:[%s807_s21 + $0x38] sm:$0xff]  ;;  %v815_v9 = vmul.f32 -15.0, %v211_v3  ;;  %v817_v10 = vmul.f32 -15.0, %v213_v4  ;;  %v212_v29 = vld [vmem:[%s807_s21 + $0x10] sm:$0xff]  ;;  %v858_v39 = vmul.f32 -15.0, %v210_v28 }
  0x13   : > { %v219_v7 = vld [vmem:[%s807_s21 + $0x48] sm:$0xff]  ;;  %v221_v8 = vld [vmem:[%s807_s21 + $0x58] sm:$0xff]  ;;  %v819_v11 = vmul.f32 -15.0, %v215_v5  ;;  %v824_v15 = vmul.f32 -15.0, %v217_v6  ;;  %v214_v32 = vld [vmem:[%s807_s21 + $0x20] sm:$0xff]  ;;  %v867_v45 = vmul.f32 -15.0, %v212_v29 }
  0x14   : > { %v223_v12 = vld [vmem:[%s807_s21 + $0x68] sm:$0xff]  ;;  %v225_v13 = vld [vmem:[%s807_s21 + $0x78] sm:$0xff]  ;;  %v826_v16 = vmul.f32 -15.0, %v219_v7  ;;  %v828_v17 = vmul.f32 -15.0, %v221_v8  ;;  %v216_v33 = vld [vmem:[%s807_s21 + $0x30] sm:$0xff]  ;;  %v860_v40 = vmul.f32 -15.0, %v214_v32 }
  0x15   : > { %v227_v14 = vld [vmem:[%s807_s21 + $0x88] sm:$0xff]  ;;  %v229_v18 = vld [vmem:[%s807_s21 + $0x98] sm:$0xff]  ;;  %v831_v19 = vmul.f32 -15.0, %v223_v12  ;;  %v295_v20 = vmax.f32 %v815_v9, %v819_v11  ;;  %v837_v23 = vmul.f32 -15.0, %v225_v13  ;;  %v296_v24 = vmax.f32 %v817_v10, %v824_v15  ;;  %v218_v34 = vld [vmem:[%s807_s21 + $0x40] sm:$0xff] }
  0x16   : > { %v231_v21 = vld [vmem:[%s807_s21 + $0xa8] sm:$0xff]  ;;  %v233_v22 = vld [vmem:[%s807_s21 + $0xb8] sm:$0xff]  ;;  %v842_v26 = vmul.f32 -15.0, %v227_v14  ;;  %v847_v30 = vmul.f32 -15.0, %v229_v18  ;;  %v220_v38 = vld [vmem:[%s807_s21 + $0x50] sm:$0xff]  ;;  %v869_v46 = vmul.f32 -15.0, %v216_v33  ;;  %v274_v60 = vmax.f32 %v858_v39, %v860_v40 }
  0x17   : > { %v235_v25 = vld [vmem:[%s807_s21 + $0xc8] sm:$0xff]  ;;  %v297_v27 = vmax.f32 %v295_v20, %v826_v16  ;;  %v298_v31 = vmax.f32 %v296_v24, %v828_v17  ;;  %v237_v35 = vld [vmem:[%s807_s21 + $0xd8] sm:$0xff]  ;;  %v854_v36 = vmul.f32 -15.0, %v231_v21  ;;  %v863_v42 = vmul.f32 -15.0, %v233_v22  ;;  %v222_v44 = vld [vmem:[%s807_s21 + $0x60] sm:$0xff] }
  0x18   : > { %v239_v41 = vld [vmem:[%s807_s21 + $0xe8] sm:$0xff]  ;;  %v241_v47 = vld [vmem:[%s807_s21 + $0xf8] sm:$0xff]  ;;  %v872_v48 = vmul.f32 -15.0, %v235_v25  ;;  %v224_v50 = vld [vmem:[%s807_s21 + $0x70] sm:$0xff]  ;;  %v876_v51 = vmul.f32 -15.0, %v218_v34  ;;  %v878_v52 = vmul.f32 -15.0, %v237_v35  ;;  %v275_v1 = vmax.f32 %v867_v45, %v869_v46 }
  0x19   : > { %v299_v37 = vmax.f32 %v297_v27, %v831_v19  ;;  %v300_v43 = vmax.f32 %v298_v31, %v837_v23  ;;  %v226_v54 = vld [vmem:[%s807_s21 + $0x80] sm:$0xff]  ;;  %v882_v55 = vmul.f32 -15.0, %v220_v38  ;;  %v884_v56 = vmul.f32 -15.0, %v239_v41  ;;  %v228_v58 = vld [vmem:[%s807_s21 + $0x90] sm:$0xff] }
  0x1a   : > { %v888_v59 = vmul.f32 -15.0, %v222_v44  ;;  %v892_v61 = vmul.f32 -15.0, %v241_v47  ;;  %v230_v63 = vld [vmem:[%s807_s21 + $0xa0] sm:$0xff]  ;;  %v896_v0 = vmul.f32 -15.0, %v224_v50  ;;  %v232_v3 = vld [vmem:[%s807_s21 + $0xb0] sm:$0xff]  ;;  %v902_v4 = vmul.f32 -15.0, %v226_v54 }
  0x1b   : > { %v301_v49 = vmax.f32 %v299_v37, %v842_v26  ;;  %v302_v53 = vmax.f32 %v300_v43, %v847_v30  ;;  %v276_v5 = vmax.f32 %v274_v60, %v876_v51  ;;  %v234_v7 = vld [vmem:[%s807_s21 + $0xc0] sm:$0xff]  ;;  %v907_v8 = vmul.f32 -15.0, %v228_v58  ;;  %v236_v14 = vld [vmem:[%s807_s21 + $0xd0] sm:$0xff] }
  0x1c   : > { %v277_v12 = vmax.f32 %v275_v1, %v882_v55  ;;  %v912_v18 = vmul.f32 -15.0, %v230_v63  ;;  %v238_v22 = vld [vmem:[%s807_s21 + $0xe0] sm:$0xff]  ;;  %v917_v24 = vmul.f32 -15.0, %v232_v3  ;;  %v240_v27 = vld [vmem:[%s807_s21 + $0xf0] sm:$0xff]  ;;  %v921_v28 = vmul.f32 -15.0, %v234_v7 }
  0x1d   : > { %v303_v57 = vmax.f32 %v301_v49, %v854_v36  ;;  %v304_v62 = vmax.f32 %v302_v53, %v863_v42  ;;  %v278_v20 = vmax.f32 %v276_v5, %v888_v59  ;;  %v924_v32 = vmul.f32 -15.0, %v236_v14 }
  0x1e   : > { %v279_v25 = vmax.f32 %v277_v12, %v896_v0  ;;  %v927_v34 = vmul.f32 -15.0, %v238_v22  ;;  %v930_v38 = vmul.f32 -15.0, %v240_v27 }
  0x1f   : > { %v305_v2 = vmax.f32 %v303_v57, %v872_v48  ;;  %v306_v6 = vmax.f32 %v304_v62, %v878_v52  ;;  %v280_v29 = vmax.f32 %v278_v20, %v902_v4 }
  0x20   : > { %v281_v33 = vmax.f32 %v279_v25, %v907_v8 }
  0x21   : > { %v307_v13 = vmax.f32 %v305_v2, %v884_v56  ;;  %v308_v21 = vmax.f32 %v306_v6, %v892_v61  ;;  %v282_v35 = vmax.f32 %v280_v29, %v912_v18 }
  0x22   : > { %v283_v41 = vmax.f32 %v281_v33, %v917_v24 }
  0x23   : > { %v309_v31 = vmax.f32 %v307_v13, %v308_v21  ;;  %v284_v43 = vmax.f32 %v282_v35, %v921_v28 }
  0x24   : > { %v285_v47 = vmax.f32 %v283_v41, %v924_v32 }
  0x25   : > { %v310_v37 = vrot.slane %v309_v31, 4  ;;  %v286_v49 = vmax.f32 %v284_v43, %v927_v34 }
  0x26   : > { %v287_v53 = vmax.f32 %v285_v47, %v930_v38 }
  0x27   : > { %v311_v44 = vmax.f32 %v309_v31, %v310_v37 }
  0x28   : > { %v288_v57 = vmax.f32 %v286_v49, %v287_v53 }
  0x29   : > { %v312_v50 = vrot.slane %v311_v44, 2 }
  0x2a   : > { %v289_v60 = vrot.slane %v288_v57, 4 }
  0x2b   : > { %v313_v54 = vmax.f32 %v311_v44, %v312_v50 }
  0x2c   : > { %v290_v63 = vmax.f32 %v288_v57, %v289_v60 }
  0x2d   : > { %v314_v58 = vrot.slane %v313_v54, 1 }
  0x2e   : > { %v291_v3 = vrot.slane %v290_v63, 2 }
  0x2f   : > { %v937_v62 = vmax.f32 %v313_v54, %v314_v58 }
  0x30   : > { %v292_v20 = vmax.f32 %v290_v63, %v291_v3 }
  0x31   : > { %v317_v1 = vsub.f32 %v815_v9, %v937_v62  ;;  %v319_v2 = vsub.f32 %v817_v10, %v937_v62  ;;  %v321_v5 = vsub.f32 %v819_v11, %v937_v62  ;;  %v323_v6 = vsub.f32 %v824_v15, %v937_v62 }
  0x32   : > { %v325_v7 = vsub.f32 %v826_v16, %v937_v62  ;;  %v327_v12 = vsub.f32 %v828_v17, %v937_v62  ;;  %v329_v10 = vsub.f32 %v831_v19, %v937_v62  ;;  %v293_v22 = vrot.slane %v292_v20, 1 }
  0x33   : > { %v350_v13 = vmul.f32 1.442695, %v317_v1  ;;  %v354_v14 = vmul.f32 1.442695, %v319_v2  ;;  %v358_v9 = vmul.f32 1.442695, %v321_v5  ;;  %v331_v35 = vsub.f32 %v837_v23, %v937_v62 }
  0x34   : > { %v362_v21 = vmul.f32 1.442695, %v323_v6  ;;  %v366_v11 = vmul.f32 1.442695, %v325_v7  ;;  %v953_v25 = vmax.f32 %v292_v20, %v293_v22  ;;  %v370_v15 = vmul.f32 1.442695, %v327_v12 }
  0x35   : > { %666 = vpow2.f32 %v350_v13  ;;  %v374_v16 = vmul.f32 1.442695, %v329_v10  ;;  %v378_v44 = vmul.f32 1.442695, %v331_v35  ;;  %v335_v47 = vsub.f32 %v847_v30, %v937_v62 }
  0x36   : > { %668 = vpow2.f32 %v354_v14  ;;  %v316_v17 = vsub.f32 %v858_v39, %v953_v25  ;;  %v318_v27 = vsub.f32 %v867_v45, %v953_v25  ;;  %v320_v29 = vsub.f32 %v860_v40, %v953_v25 }
  0x37   : > { %670 = vpow2.f32 %v358_v9  ;;  %v322_v19 = vsub.f32 %v869_v46, %v953_v25  ;;  %v324_v31 = vsub.f32 %v876_v51, %v953_v25  ;;  %v326_v33 = vsub.f32 %v882_v55, %v953_v25 }
  0x38   : > { %672 = vpow2.f32 %v362_v21  ;;  %v348_v39 = vmul.f32 1.442695, %v316_v17  ;;  %v352_v37 = vmul.f32 1.442695, %v318_v27  ;;  %v356_v41 = vmul.f32 1.442695, %v320_v29 }
  0x39   : > { %674 = vpow2.f32 %v366_v11  ;;  %v360_v45 = vmul.f32 1.442695, %v322_v19  ;;  %v328_v40 = vsub.f32 %v888_v59, %v953_v25  ;;  %v364_v46 = vmul.f32 1.442695, %v324_v31 }
  0x3a   : > { %676 = vpow2.f32 %v370_v15  ;;  %v330_v51 = vsub.f32 %v896_v0, %v953_v25  ;;  %v368_v43 = vmul.f32 1.442695, %v326_v33  ;;  %v333_v55 = vsub.f32 %v842_v26, %v937_v62 }
  0x3b   : > { %678 = vpow2.f32 %v374_v16  ;;  %v372_v50 = vmul.f32 1.442695, %v328_v40  ;;  %v332_v59 = vsub.f32 %v902_v4, %v953_v25  ;;  %v334_v57 = vsub.f32 %v907_v8, %v953_v25 }
  0x3c   : > { %680 = vpow2.f32 %v348_v39  ;;  %v376_v0 = vmul.f32 1.442695, %v330_v51  ;;  %v382_v58 = vmul.f32 1.442695, %v333_v55  ;;  %v337_v60 = vsub.f32 %v854_v36, %v937_v62 }
  0x3d   : > { %682 = vpow2.f32 %v352_v37  ;;  %v386_v30 = vmul.f32 1.442695, %v335_v47  ;;  %v339_v63 = vsub.f32 %v863_v42, %v937_v62  ;;  %v380_v1 = vmul.f32 1.442695, %v332_v59 }
  0x3e   : > { %684 = vpow2.f32 %v356_v41  ;;  %v336_v2 = vsub.f32 %v912_v18, %v953_v25  ;;  %v384_v8 = vmul.f32 1.442695, %v334_v57  ;;  %v338_v5 = vsub.f32 %v917_v24, %v953_v25 }
  0x3f   : > { %v667_v23 = vpop.eup %666  ;;  %686 = vpow2.f32 %v360_v45  ;;  %v390_v36 = vmul.f32 1.442695, %v337_v60  ;;  %v341_v7 = vsub.f32 %v872_v48, %v937_v62  ;;  %v394_v42 = vmul.f32 1.442695, %v339_v63 }
  0x40   : > { %v669_v49 = vpop.eup %668  ;;  %688 = vpow2.f32 %v364_v46  ;;  %v343_v13 = vsub.f32 %v878_v52, %v937_v62  ;;  %v388_v20 = vmul.f32 1.442695, %v336_v2  ;;  %v340_v9 = vsub.f32 %v921_v28, %v953_v25 }
  0x41   : > { %v671_v53 = vpop.eup %670  ;;  %v607_v54 = vpack.c.bf16 %v669_v49, %v667_v23  ;;  %690 = vpow2.f32 %v368_v43  ;;  %v392_v10 = vmul.f32 1.442695, %v338_v5  ;;  %v342_v48 = vsub.f32 %v924_v32, %v953_v25  ;;  %v412_v5 = vld [vmem:[%s1024_s1] sm:$0xf] }
  0x42   : > { %v673_v26 = vpop.eup %672  ;;  %692 = vpow2.f32 %v378_v44  ;;  %v398_v11 = vmul.f32 1.442695, %v341_v7  ;;  %v345_v52 = vsub.f32 %v884_v56, %v937_v62  ;;  %v402_v17 = vmul.f32 1.442695, %v343_v13 }
  0x43   : > { %608 = vmatprep.subr.bf16.mxu0 %v607_v54  ;;  %v675_v4 = vpop.eup %674  ;;  %694 = vpow2.f32 %v372_v50  ;;  %v611_v18 = vpack.c.bf16 %v673_v26, %v671_v53  ;;  %v347_v28 = vsub.f32 %v892_v61, %v937_v62  ;;  %v396_v19 = vmul.f32 1.442695, %v340_v9 }
  0x44   : > { %v677_v3 = vpop.eup %676  ;;  %696 = vpow2.f32 %v376_v0  ;;  %v400_v31 = vmul.f32 1.442695, %v342_v48  ;;  %v344_v33 = vsub.f32 %v927_v34, %v953_v25  ;;  %v406_v35 = vmul.f32 1.442695, %v345_v52 }
  0x45   : > { %v679_v6 = vpop.eup %678  ;;  %698 = vpow2.f32 %v382_v58  ;;  %v615_v29 = vpack.c.bf16 %v677_v3, %v675_v4  ;;  %v346_v39 = vsub.f32 %v930_v38, %v953_v25  ;;  %v410_v41 = vmul.f32 1.442695, %v347_v28 }
  0x46   : > { %v681_v12 = vpop.eup %680  ;;  %700 = vpow2.f32 %v386_v30  ;;  %v404_v51 = vmul.f32 1.442695, %v344_v33 }
  0x47   : > { %v683_v14 = vpop.eup %682  ;;  %702 = vpow2.f32 %v380_v1  ;;  %v408_v34 = vmul.f32 1.442695, %v346_v39 }
  0x48   : > { %v685_v24 = vpop.eup %684  ;;  %v609_v21 = vpack.c.bf16 %v683_v14, %v681_v12  ;;  %704 = vpow2.f32 %v384_v8 }
  0x49   : > { %v687_v22 = vpop.eup %686  ;;  %706 = vpow2.f32 %v390_v36 }
  0x4a   : > { %v689_v15 = vpop.eup %688  ;;  %610 = vmatpush1.bf16.msra.mxu0 %v609_v21  ;;  %v613_v16 = vpack.c.bf16 %v687_v22, %v685_v24  ;;  %708 = vpow2.f32 %v394_v42 }
  0x4b   : > { %v691_v27 = vpop.eup %690  ;;  %612 = vmatprep.subr.bf16.mxu0 %v611_v18  ;;  %710 = vpow2.f32 %v388_v20 }
  0x4c   : > { %v693_v32 = vpop.eup %692  ;;  %712 = vpow2.f32 %v392_v10  ;;  %v617_v61 = vpack.c.bf16 %v691_v27, %v689_v15 }
  0x4d   : > { %v695_v56 = vpop.eup %694  ;;  %714 = vpow2.f32 %v398_v11  ;;  %v619_v40 = vpack.c.bf16 %v693_v32, %v679_v6 }
  0x4e   : > { %v697_v37 = vpop.eup %696  ;;  %614 = vmatpush1.bf16.msra.mxu0 %v613_v16  ;;  %716 = vpow2.f32 %v402_v17 }
  0x4f   : > { %v699_v45 = vpop.eup %698  ;;  %616 = vmatprep.subr.bf16.mxu0 %v615_v29  ;;  %718 = vpow2.f32 %v396_v19  ;;  %v621_v23 = vpack.c.bf16 %v697_v37, %v695_v56 }
  0x50   : > { %v701_v46 = vpop.eup %700  ;;  %720 = vpow2.f32 %v400_v31 }
  0x51   : > { %v703_v43 = vpop.eup %702  ;;  %722 = vpow2.f32 %v406_v35  ;;  %v623_v44 = vpack.c.bf16 %v701_v46, %v699_v45 }
  0x52   : > { %v705_v55 = vpop.eup %704  ;;  %618 = vmatpush1.bf16.msra.mxu0 %v617_v61  ;;  %724 = vpow2.f32 %v410_v41 }
  0x53   : > { %v707_v38 = vpop.eup %706  ;;  %620 = vmatprep.subr.bf16.mxu0 %v619_v40  ;;  %726 = vpow2.f32 %v404_v51  ;;  %v625_v59 = vpack.c.bf16 %v705_v55, %v703_v43 }
  0x54   : > { %v709_v47 = vpop.eup %708  ;;  %728 = vpow2.f32 %v408_v34 }
  0x55   : > { %v711_v49 = vpop.eup %710  ;;  %v627_v54 = vpack.c.bf16 %v709_v47, %v707_v38 }
  0x56   : > { %v713_v50 = vpop.eup %712  ;;  %622 = vmatpush1.bf16.msra.mxu0 %v621_v23 }
  0x57   : > { %v715_v53 = vpop.eup %714  ;;  %624 = vmatprep.subr.bf16.mxu0 %v623_v44  ;;  %v629_v58 = vpack.c.bf16 %v713_v50, %v711_v49 }
  0x58   : > { %v717_v0 = vpop.eup %716 }
  0x59   : > { %v719_v57 = vpop.eup %718  ;;  %v631_v30 = vpack.c.bf16 %v717_v0, %v715_v53 }
  0x5a   : > { %v721_v26 = vpop.eup %720  ;;  %626 = vmatpush1.bf16.msra.mxu0 %v625_v59 }
  0x5b   : > { %v723_v60 = vpop.eup %722  ;;  %628 = vmatprep.subr.bf16.mxu0 %v627_v54  ;;  %v633_v1 = vpack.c.bf16 %v721_v26, %v719_v57 }
  0x5c   : > { %v725_v63 = vpop.eup %724 }
  0x5d   : > { %v727_v4 = vpop.eup %726  ;;  %v635_v3 = vpack.c.bf16 %v725_v63, %v723_v60 }
  0x5e   : > { %630 = vmatpush1.bf16.msra.mxu0 %v629_v58  ;;  %v729_v2 = vpop.eup %728 }
  0x5f   : > { %632 = vmatprep.subr.bf16.mxu0 %v631_v30  ;;  %v637_v8 = vpack.c.bf16 %v729_v2, %v727_v4 }
  0x62   : > { %634 = vmatpush1.bf16.msra.mxu0 %v633_v1 }
  0x63   : > { %636 = vmatprep.subr.bf16.mxu0 %v635_v3 }
  0x66   : > { %638 = vmatpush1.bf16.msra.mxu0 %v637_v8 }
  0x69   : > { %478 = vmatmul.mubr.f32.vlgmr.msra.gmra.mrb[0].mxu0 %v412_v5 }
  0x87   : > { %v488_v7 = vpop.permute.xlu0 %487 }
  0x88   : > { %v490_v12 = vadd.f32 %v488_v7, %v953_v25  ;;  %v491_v13 = vadd.f32 %v488_v7, %v937_v62 }
 0x13c   : > { %v479_v6 = vpop.f32.mrb[0].mxu0 }
 0x13d   : > { %730 = vlog2.f32 %v479_v6  ;;  %v481_v36 = vpop.f32.mrb[1].mxu0 }
 0x13e   : > { %732 = vlog2.f32 %v481_v36 }
 0x147   : > { %v731_v42 = vpop.eup %730 }
 0x148   : > { %v733_v14 = vpop.eup %732  ;;  %v493_v18 = vmul.f32 0.6931472, %v731_v42 }
 0x149   : > { %v495_v20 = vmul.f32 0.6931472, %v733_v14 }
 0x14a   : > { %v496_v9 = vadd.f32 %v493_v18, %v490_v12 }
 0x14b   : > { %v497_v24 = vadd.f32 %v495_v20, %v491_v13 }
 0x14c   : > { %v498_v21 = vmul.f32 0.06666667, %v496_v9 }
 0x14d   : > { %v499_v10 = vmul.f32 0.06666667, %v497_v24 }
 0x14e   : > { %v500_v48 = vsub.f32 0.0, %v498_v21 }
 0x14f   : > { %v501_v22 = vsub.f32 0.0, %v499_v10 }
 0x151   : > { %v504_v11 = vcombine.low %v500_v48, %v501_v22 }
 0x153   : > { %506 = vst [vmem:[%s208_s27] sm:$0xff] %v504_v11 }
 0x154 PF: > { %s13_s14 = sadd.s32 1, %s756_s14   ;;  %s1027_s12 = smov %s752_s13 }
 0x155   : > { %p10_p5 = scmp.ge.s32.totalorder %s13_s14, 4   ;;  %s1028_s13 = smov %s1030_s15 }
 0x157   :  { %12 = sbr.rel (!%p10_p5) target bundleno = 2 (0x2), region = 62 }

</bundles_post_ra>
